<compile_context>
chip_gen: v7x
topology: tpu7x:2x2x1
jax: 0.10.0
libtpu: 0.0.40
codegen_flags: <defaults>
</compile_context>

<pallas_src>
import jax
import jax.numpy as jnp
from jax.experimental import pallas as pl
from jax.experimental.pallas import tpu as pltpu

INP, HL, OUT = 1, 16, 1
LANE = 128          # lanes per vreg (batch maps here)
SUB = 8             # sublane granularity


def mlp_kernel(w1_ref, b1_ref, w2_ref, b2_ref, x_ref, o_ref):
    # x_ref / o_ref: (block_rows, 128) f32, batch on lanes.
    # w1_ref,b1_ref,w2_ref: SMEM (HL,) f32;  b2_ref: SMEM (1,) f32.
    x = x_ref[...]
    acc = jnp.zeros_like(x)
    for j in range(HL):                                   # statically unrolled (HL=16)
        h = jnp.tanh(x * w1_ref[j] + b1_ref[j])           # VPU mul/add + EUP tanh
        acc = acc + h * w2_ref[j]                         # VPU accumulate
    o_ref[...] = acc + b2_ref[0]


def net_forward(x, w1, b1, w2, b2, block_rows=512):
    """x: (N, 1) f32; w1: (HL, INP); b1: (HL,); w2: (OUT, HL); b2: (OUT,)."""
    n = x.shape[0]
    xf = x.reshape(-1).astype(jnp.float32)                # (N,)

    # Pad batch so it tiles into (rows_pad, 128) with rows_pad % block_rows == 0.
    rows = int(pl.cdiv(max(n, 1), LANE))
    br = int(pl.cdiv(min(block_rows, rows), SUB)) * SUB   # block rows, multiple of 8
    rows_pad = int(pl.cdiv(rows, br)) * br
    n_pad = rows_pad * LANE
    xp = jnp.pad(xf, (0, n_pad - n))
    x2d = xp.reshape(rows_pad, LANE)                      # lane-dense batch slab
    num_tiles = rows_pad // br

    # Flatten tiny params for SMEM residency.
    w1f = w1.reshape(HL).astype(jnp.float32)              # (16,)
    b1f = b1.reshape(HL).astype(jnp.float32)              # (16,)
    w2f = w2.reshape(HL).astype(jnp.float32)              # (16,)
    b2f = b2.reshape(OUT).astype(jnp.float32)             # (1,)

    y2d = pl.pallas_call(
        mlp_kernel,
        out_shape=jax.ShapeDtypeStruct((rows_pad, LANE), jnp.float32),
        grid=(num_tiles,),
        in_specs=[
            pl.BlockSpec(memory_space=pltpu.MemorySpace.SMEM),   # w1
            pl.BlockSpec(memory_space=pltpu.MemorySpace.SMEM),   # b1
            pl.BlockSpec(memory_space=pltpu.MemorySpace.SMEM),   # w2
            pl.BlockSpec(memory_space=pltpu.MemorySpace.SMEM),   # b2
            pl.BlockSpec((br, LANE), lambda i: (i, 0)),          # x tile
        ],
        out_specs=pl.BlockSpec((br, LANE), lambda i: (i, 0)),
        compiler_params=pltpu.CompilerParams(
            dimension_semantics=("parallel",)                    # megacore on v7x
        ),
    )(w1f, b1f, w2f, b2f, x2d)

    return y2d.reshape(n_pad)[:n].reshape(n, OUT)


def init_params(key):
    # Deterministic init mimicking PyTorch's default Linear init
    # (uniform in [-1/sqrt(fan_in), 1/sqrt(fan_in)]).
    k1, k2, k3, k4 = jax.random.split(key, 4)
    bound1 = 1.0 / (INP ** 0.5)
    bound2 = 1.0 / (HL ** 0.5)
    w1 = jax.random.uniform(k1, (HL, INP), jnp.float32, -bound1, bound1)
    b1 = jax.random.uniform(k2, (HL,), jnp.float32, -bound1, bound1)
    w2 = jax.random.uniform(k3, (OUT, HL), jnp.float32, -bound2, bound2)
    b2 = jax.random.uniform(k4, (OUT,), jnp.float32, -bound2, bound2)
    return w1, b1, w2, b2


if __name__ == "__main__":
    key = jax.random.PRNGKey(0)
    kx, kp = jax.random.split(key)

    N = 8
    x = jax.random.normal(kx, (N, INP), jnp.float32)
    w1, b1, w2, b2 = init_params(kp)

    y = net_forward(x, w1, b1, w2, b2)
    jax.block_until_ready(y)

    ref = jnp.tanh(x @ w1.T + b1) @ w2.T + b2
    assert y.shape == (N, OUT)
    assert jnp.allclose(y, ref, atol=1e-5, rtol=1e-5)

    # Exercise the multi-tile (grid > 1) pipelined path with a small forced block.
    N2 = 2000
    x2 = jax.random.normal(jax.random.PRNGKey(1), (N2, INP), jnp.float32)
    y2 = net_forward(x2, w1, b1, w2, b2, block_rows=8)
    jax.block_until_ready(y2)
    ref2 = jnp.tanh(x2 @ w1.T + b1) @ w2.T + b2
    assert y2.shape == (N2, OUT)
    assert jnp.allclose(y2, ref2, atol=1e-5, rtol=1e-5)

    print("KERNEL_OK")
</pallas_src>

<mosaic_0001>
module attributes {stable_mosaic.version = 11 : i64} {
  func.func @mlp_kernel(%arg0: i32, %arg1: memref<16xf32, #tpu.memory_space<smem>>, %arg2: memref<16xf32, #tpu.memory_space<smem>>, %arg3: memref<16xf32, #tpu.memory_space<smem>>, %arg4: memref<1xf32, #tpu.memory_space<smem>>, %arg5: memref<8x128xf32, #tpu.memory_space<vmem>>, %arg6: memref<8x128xf32, #tpu.memory_space<vmem>>) attributes {dimension_semantics = [#tpu.dimension_semantics<parallel>], iteration_bounds = array<i64: 1>, scalar_prefetch = 0 : i64, scratch_operands = 0 : i64, tpu.core_type = #tpu.core_type<tc>, window_params = [{transform_indices = @transform_0, window_bounds = array<i64: 16>}, {transform_indices = @transform_1, window_bounds = array<i64: 16>}, {transform_indices = @transform_2, window_bounds = array<i64: 16>}, {transform_indices = @transform_3, window_bounds = array<i64: 1>}, {transform_indices = @transform_4, window_bounds = array<i64: 8, 128>}, {transform_indices = @transform_5, window_bounds = array<i64: 8, 128>}]} {
    %c0 = arith.constant 0 : index
    %c0_0 = arith.constant 0 : index
    %0 = vector.load %arg5[%c0, %c0_0] : memref<8x128xf32, #tpu.memory_space<vmem>>, vector<8x128xf32>
    %cst = arith.constant 0.000000e+00 : f32
    %1 = vector.broadcast %cst : f32 to vector<8x128xf32>
    %c0_1 = arith.constant 0 : index
    %2 = memref.load %arg1[%c0_1] : memref<16xf32, #tpu.memory_space<smem>>
    %3 = vector.broadcast %2 : f32 to vector<8x128xf32>
    %4 = arith.mulf %0, %3 : vector<8x128xf32>
    %c0_2 = arith.constant 0 : index
    %5 = memref.load %arg2[%c0_2] : memref<16xf32, #tpu.memory_space<smem>>
    %6 = vector.broadcast %5 : f32 to vector<8x128xf32>
    %7 = arith.addf %4, %6 : vector<8x128xf32>
    %8 = math.tanh %7 : vector<8x128xf32>
    %c0_3 = arith.constant 0 : index
    %9 = memref.load %arg3[%c0_3] : memref<16xf32, #tpu.memory_space<smem>>
    %10 = vector.broadcast %9 : f32 to vector<8x128xf32>
    %11 = arith.mulf %8, %10 : vector<8x128xf32>
    %12 = arith.addf %1, %11 : vector<8x128xf32>
    %c1 = arith.constant 1 : index
    %13 = memref.load %arg1[%c1] : memref<16xf32, #tpu.memory_space<smem>>
    %14 = vector.broadcast %13 : f32 to vector<8x128xf32>
    %15 = arith.mulf %0, %14 : vector<8x128xf32>
    %c1_4 = arith.constant 1 : index
    %16 = memref.load %arg2[%c1_4] : memref<16xf32, #tpu.memory_space<smem>>
    %17 = vector.broadcast %16 : f32 to vector<8x128xf32>
    %18 = arith.addf %15, %17 : vector<8x128xf32>
    %19 = math.tanh %18 : vector<8x128xf32>
    %c1_5 = arith.constant 1 : index
    %20 = memref.load %arg3[%c1_5] : memref<16xf32, #tpu.memory_space<smem>>
    %21 = vector.broadcast %20 : f32 to vector<8x128xf32>
    %22 = arith.mulf %19, %21 : vector<8x128xf32>
    %23 = arith.addf %12, %22 : vector<8x128xf32>
    %c2 = arith.constant 2 : index
    %24 = memref.load %arg1[%c2] : memref<16xf32, #tpu.memory_space<smem>>
    %25 = vector.broadcast %24 : f32 to vector<8x128xf32>
    %26 = arith.mulf %0, %25 : vector<8x128xf32>
    %c2_6 = arith.constant 2 : index
    %27 = memref.load %arg2[%c2_6] : memref<16xf32, #tpu.memory_space<smem>>
    %28 = vector.broadcast %27 : f32 to vector<8x128xf32>
    %29 = arith.addf %26, %28 : vector<8x128xf32>
    %30 = math.tanh %29 : vector<8x128xf32>
    %c2_7 = arith.constant 2 : index
    %31 = memref.load %arg3[%c2_7] : memref<16xf32, #tpu.memory_space<smem>>
    %32 = vector.broadcast %31 : f32 to vector<8x128xf32>
    %33 = arith.mulf %30, %32 : vector<8x128xf32>
    %34 = arith.addf %23, %33 : vector<8x128xf32>
    %c3 = arith.constant 3 : index
    %35 = memref.load %arg1[%c3] : memref<16xf32, #tpu.memory_space<smem>>
    %36 = vector.broadcast %35 : f32 to vector<8x128xf32>
    %37 = arith.mulf %0, %36 : vector<8x128xf32>
    %c3_8 = arith.constant 3 : index
    %38 = memref.load %arg2[%c3_8] : memref<16xf32, #tpu.memory_space<smem>>
    %39 = vector.broadcast %38 : f32 to vector<8x128xf32>
    %40 = arith.addf %37, %39 : vector<8x128xf32>
    %41 = math.tanh %40 : vector<8x128xf32>
    %c3_9 = arith.constant 3 : index
    %42 = memref.load %arg3[%c3_9] : memref<16xf32, #tpu.memory_space<smem>>
    %43 = vector.broadcast %42 : f32 to vector<8x128xf32>
    %44 = arith.mulf %41, %43 : vector<8x128xf32>
    %45 = arith.addf %34, %44 : vector<8x128xf32>
    %c4 = arith.constant 4 : index
    %46 = memref.load %arg1[%c4] : memref<16xf32, #tpu.memory_space<smem>>
    %47 = vector.broadcast %46 : f32 to vector<8x128xf32>
    %48 = arith.mulf %0, %47 : vector<8x128xf32>
    %c4_10 = arith.constant 4 : index
    %49 = memref.load %arg2[%c4_10] : memref<16xf32, #tpu.memory_space<smem>>
    %50 = vector.broadcast %49 : f32 to vector<8x128xf32>
    %51 = arith.addf %48, %50 : vector<8x128xf32>
    %52 = math.tanh %51 : vector<8x128xf32>
    %c4_11 = arith.constant 4 : index
    %53 = memref.load %arg3[%c4_11] : memref<16xf32, #tpu.memory_space<smem>>
    %54 = vector.broadcast %53 : f32 to vector<8x128xf32>
    %55 = arith.mulf %52, %54 : vector<8x128xf32>
    %56 = arith.addf %45, %55 : vector<8x128xf32>
    %c5 = arith.constant 5 : index
    %57 = memref.load %arg1[%c5] : memref<16xf32, #tpu.memory_space<smem>>
    %58 = vector.broadcast %57 : f32 to vector<8x128xf32>
    %59 = arith.mulf %0, %58 : vector<8x128xf32>
    %c5_12 = arith.constant 5 : index
    %60 = memref.load %arg2[%c5_12] : memref<16xf32, #tpu.memory_space<smem>>
    %61 = vector.broadcast %60 : f32 to vector<8x128xf32>
    %62 = arith.addf %59, %61 : vector<8x128xf32>
    %63 = math.tanh %62 : vector<8x128xf32>
    %c5_13 = arith.constant 5 : index
    %64 = memref.load %arg3[%c5_13] : memref<16xf32, #tpu.memory_space<smem>>
    %65 = vector.broadcast %64 : f32 to vector<8x128xf32>
    %66 = arith.mulf %63, %65 : vector<8x128xf32>
    %67 = arith.addf %56, %66 : vector<8x128xf32>
    %c6 = arith.constant 6 : index
    %68 = memref.load %arg1[%c6] : memref<16xf32, #tpu.memory_space<smem>>
    %69 = vector.broadcast %68 : f32 to vector<8x128xf32>
    %70 = arith.mulf %0, %69 : vector<8x128xf32>
    %c6_14 = arith.constant 6 : index
    %71 = memref.load %arg2[%c6_14] : memref<16xf32, #tpu.memory_space<smem>>
    %72 = vector.broadcast %71 : f32 to vector<8x128xf32>
    %73 = arith.addf %70, %72 : vector<8x128xf32>
    %74 = math.tanh %73 : vector<8x128xf32>
    %c6_15 = arith.constant 6 : index
    %75 = memref.load %arg3[%c6_15] : memref<16xf32, #tpu.memory_space<smem>>
    %76 = vector.broadcast %75 : f32 to vector<8x128xf32>
    %77 = arith.mulf %74, %76 : vector<8x128xf32>
    %78 = arith.addf %67, %77 : vector<8x128xf32>
    %c7 = arith.constant 7 : index
    %79 = memref.load %arg1[%c7] : memref<16xf32, #tpu.memory_space<smem>>
    %80 = vector.broadcast %79 : f32 to vector<8x128xf32>
    %81 = arith.mulf %0, %80 : vector<8x128xf32>
    %c7_16 = arith.constant 7 : index
    %82 = memref.load %arg2[%c7_16] : memref<16xf32, #tpu.memory_space<smem>>
    %83 = vector.broadcast %82 : f32 to vector<8x128xf32>
    %84 = arith.addf %81, %83 : vector<8x128xf32>
    %85 = math.tanh %84 : vector<8x128xf32>
    %c7_17 = arith.constant 7 : index
    %86 = memref.load %arg3[%c7_17] : memref<16xf32, #tpu.memory_space<smem>>
    %87 = vector.broadcast %86 : f32 to vector<8x128xf32>
    %88 = arith.mulf %85, %87 : vector<8x128xf32>
    %89 = arith.addf %78, %88 : vector<8x128xf32>
    %c8 = arith.constant 8 : index
    %90 = memref.load %arg1[%c8] : memref<16xf32, #tpu.memory_space<smem>>
    %91 = vector.broadcast %90 : f32 to vector<8x128xf32>
    %92 = arith.mulf %0, %91 : vector<8x128xf32>
    %c8_18 = arith.constant 8 : index
    %93 = memref.load %arg2[%c8_18] : memref<16xf32, #tpu.memory_space<smem>>
    %94 = vector.broadcast %93 : f32 to vector<8x128xf32>
    %95 = arith.addf %92, %94 : vector<8x128xf32>
    %96 = math.tanh %95 : vector<8x128xf32>
    %c8_19 = arith.constant 8 : index
    %97 = memref.load %arg3[%c8_19] : memref<16xf32, #tpu.memory_space<smem>>
    %98 = vector.broadcast %97 : f32 to vector<8x128xf32>
    %99 = arith.mulf %96, %98 : vector<8x128xf32>
    %100 = arith.addf %89, %99 : vector<8x128xf32>
    %c9 = arith.constant 9 : index
    %101 = memref.load %arg1[%c9] : memref<16xf32, #tpu.memory_space<smem>>
    %102 = vector.broadcast %101 : f32 to vector<8x128xf32>
    %103 = arith.mulf %0, %102 : vector<8x128xf32>
    %c9_20 = arith.constant 9 : index
    %104 = memref.load %arg2[%c9_20] : memref<16xf32, #tpu.memory_space<smem>>
    %105 = vector.broadcast %104 : f32 to vector<8x128xf32>
    %106 = arith.addf %103, %105 : vector<8x128xf32>
    %107 = math.tanh %106 : vector<8x128xf32>
    %c9_21 = arith.constant 9 : index
    %108 = memref.load %arg3[%c9_21] : memref<16xf32, #tpu.memory_space<smem>>
    %109 = vector.broadcast %108 : f32 to vector<8x128xf32>
    %110 = arith.mulf %107, %109 : vector<8x128xf32>
    %111 = arith.addf %100, %110 : vector<8x128xf32>
    %c10 = arith.constant 10 : index
    %112 = memref.load %arg1[%c10] : memref<16xf32, #tpu.memory_space<smem>>
    %113 = vector.broadcast %112 : f32 to vector<8x128xf32>
    %114 = arith.mulf %0, %113 : vector<8x128xf32>
    %c10_22 = arith.constant 10 : index
    %115 = memref.load %arg2[%c10_22] : memref<16xf32, #tpu.memory_space<smem>>
    %116 = vector.broadcast %115 : f32 to vector<8x128xf32>
    %117 = arith.addf %114, %116 : vector<8x128xf32>
    %118 = math.tanh %117 : vector<8x128xf32>
    %c10_23 = arith.constant 10 : index
    %119 = memref.load %arg3[%c10_23] : memref<16xf32, #tpu.memory_space<smem>>
    %120 = vector.broadcast %119 : f32 to vector<8x128xf32>
    %121 = arith.mulf %118, %120 : vector<8x128xf32>
    %122 = arith.addf %111, %121 : vector<8x128xf32>
    %c11 = arith.constant 11 : index
    %123 = memref.load %arg1[%c11] : memref<16xf32, #tpu.memory_space<smem>>
    %124 = vector.broadcast %123 : f32 to vector<8x128xf32>
    %125 = arith.mulf %0, %124 : vector<8x128xf32>
    %c11_24 = arith.constant 11 : index
    %126 = memref.load %arg2[%c11_24] : memref<16xf32, #tpu.memory_space<smem>>
    %127 = vector.broadcast %126 : f32 to vector<8x128xf32>
    %128 = arith.addf %125, %127 : vector<8x128xf32>
    %129 = math.tanh %128 : vector<8x128xf32>
    %c11_25 = arith.constant 11 : index
    %130 = memref.load %arg3[%c11_25] : memref<16xf32, #tpu.memory_space<smem>>
    %131 = vector.broadcast %130 : f32 to vector<8x128xf32>
    %132 = arith.mulf %129, %131 : vector<8x128xf32>
    %133 = arith.addf %122, %132 : vector<8x128xf32>
    %c12 = arith.constant 12 : index
    %134 = memref.load %arg1[%c12] : memref<16xf32, #tpu.memory_space<smem>>
    %135 = vector.broadcast %134 : f32 to vector<8x128xf32>
    %136 = arith.mulf %0, %135 : vector<8x128xf32>
    %c12_26 = arith.constant 12 : index
    %137 = memref.load %arg2[%c12_26] : memref<16xf32, #tpu.memory_space<smem>>
    %138 = vector.broadcast %137 : f32 to vector<8x128xf32>
    %139 = arith.addf %136, %138 : vector<8x128xf32>
    %140 = math.tanh %139 : vector<8x128xf32>
    %c12_27 = arith.constant 12 : index
    %141 = memref.load %arg3[%c12_27] : memref<16xf32, #tpu.memory_space<smem>>
    %142 = vector.broadcast %141 : f32 to vector<8x128xf32>
    %143 = arith.mulf %140, %142 : vector<8x128xf32>
    %144 = arith.addf %133, %143 : vector<8x128xf32>
    %c13 = arith.constant 13 : index
    %145 = memref.load %arg1[%c13] : memref<16xf32, #tpu.memory_space<smem>>
    %146 = vector.broadcast %145 : f32 to vector<8x128xf32>
    %147 = arith.mulf %0, %146 : vector<8x128xf32>
    %c13_28 = arith.constant 13 : index
    %148 = memref.load %arg2[%c13_28] : memref<16xf32, #tpu.memory_space<smem>>
    %149 = vector.broadcast %148 : f32 to vector<8x128xf32>
    %150 = arith.addf %147, %149 : vector<8x128xf32>
    %151 = math.tanh %150 : vector<8x128xf32>
    %c13_29 = arith.constant 13 : index
    %152 = memref.load %arg3[%c13_29] : memref<16xf32, #tpu.memory_space<smem>>
    %153 = vector.broadcast %152 : f32 to vector<8x128xf32>
    %154 = arith.mulf %151, %153 : vector<8x128xf32>
    %155 = arith.addf %144, %154 : vector<8x128xf32>
    %c14 = arith.constant 14 : index
    %156 = memref.load %arg1[%c14] : memref<16xf32, #tpu.memory_space<smem>>
    %157 = vector.broadcast %156 : f32 to vector<8x128xf32>
    %158 = arith.mulf %0, %157 : vector<8x128xf32>
    %c14_30 = arith.constant 14 : index
    %159 = memref.load %arg2[%c14_30] : memref<16xf32, #tpu.memory_space<smem>>
    %160 = vector.broadcast %159 : f32 to vector<8x128xf32>
    %161 = arith.addf %158, %160 : vector<8x128xf32>
    %162 = math.tanh %161 : vector<8x128xf32>
    %c14_31 = arith.constant 14 : index
    %163 = memref.load %arg3[%c14_31] : memref<16xf32, #tpu.memory_space<smem>>
    %164 = vector.broadcast %163 : f32 to vector<8x128xf32>
    %165 = arith.mulf %162, %164 : vector<8x128xf32>
    %166 = arith.addf %155, %165 : vector<8x128xf32>
    %c15 = arith.constant 15 : index
    %167 = memref.load %arg1[%c15] : memref<16xf32, #tpu.memory_space<smem>>
    %168 = vector.broadcast %167 : f32 to vector<8x128xf32>
    %169 = arith.mulf %0, %168 : vector<8x128xf32>
    %c15_32 = arith.constant 15 : index
    %170 = memref.load %arg2[%c15_32] : memref<16xf32, #tpu.memory_space<smem>>
    %171 = vector.broadcast %170 : f32 to vector<8x128xf32>
    %172 = arith.addf %169, %171 : vector<8x128xf32>
    %173 = math.tanh %172 : vector<8x128xf32>
    %c15_33 = arith.constant 15 : index
    %174 = memref.load %arg3[%c15_33] : memref<16xf32, #tpu.memory_space<smem>>
    %175 = vector.broadcast %174 : f32 to vector<8x128xf32>
    %176 = arith.mulf %173, %175 : vector<8x128xf32>
    %177 = arith.addf %166, %176 : vector<8x128xf32>
    %c0_34 = arith.constant 0 : index
    %178 = memref.load %arg4[%c0_34] : memref<1xf32, #tpu.memory_space<smem>>
    %179 = vector.broadcast %178 : f32 to vector<8x128xf32>
    %180 = arith.addf %177, %179 : vector<8x128xf32>
    %c0_35 = arith.constant 0 : index
    %c0_36 = arith.constant 0 : index
    %181 = vector.load %arg6[%c0_35, %c0_36] : memref<8x128xf32, #tpu.memory_space<vmem>>, vector<8x128xf32>
    tpu.vector_store %arg6[%c0_35, %c0_36], %180 {strides = array<i32>} : memref<8x128xf32, #tpu.memory_space<vmem>>, vector<8x128xf32>,
    return
  }
  func.func @transform_0(%arg0: i32) -> i32 {
    %c0_i32 = arith.constant 0 : i32
    %c0_i32_0 = arith.constant 0 : i32
    return %c0_i32 : i32
  }
  func.func @transform_1(%arg0: i32) -> i32 {
    %c0_i32 = arith.constant 0 : i32
    %c0_i32_0 = arith.constant 0 : i32
    return %c0_i32 : i32
  }
  func.func @transform_2(%arg0: i32) -> i32 {
    %c0_i32 = arith.constant 0 : i32
    %c0_i32_0 = arith.constant 0 : i32
    return %c0_i32 : i32
  }
  func.func @transform_3(%arg0: i32) -> i32 {
    %c0_i32 = arith.constant 0 : i32
    %c0_i32_0 = arith.constant 0 : i32
    return %c0_i32 : i32
  }
  func.func @transform_4(%arg0: i32) -> (i32, i32) {
    %c0_i32 = arith.constant 0 : i32
    %c0_i32_0 = arith.constant 0 : i32
    return %arg0, %c0_i32 : i32, i32
  }
  func.func @transform_5(%arg0: i32) -> (i32, i32) {
    %c0_i32 = arith.constant 0 : i32
    %c0_i32_0 = arith.constant 0 : i32
    return %arg0, %c0_i32 : i32, i32
  }
}

</mosaic_0001>

<bundles_post_ra>
// kernel: tpu_custom_call.1
= control target key start
LH: loop header
LB: loop body
LE: loop exit
PB: predicated region body
PF: predicated region fallthrough
CT: control target
= control target key end

     0   :  { %11 = vsyncpa [#allocation5], 0  ;;  %s596_s0 = inlined_call_operand.vmem [shape: f32[16], index: 0, kind: input, shape index: {}]   ;;  %s597_s1 = inlined_call_operand.vmem [shape: f32[16], index: 1, kind: input, shape index: {}]   ;;  %s598_s2 = inlined_call_operand.vmem [shape: f32[16], index: 2, kind: input, shape index: {}]   ;;  %s599_s3 = inlined_call_operand.<no memory space> [shape: f32[1], index: 3, kind: input, shape index: {}]   ;;  %s600_s4 = inlined_call_operand.vmem [shape: f32[8,128], index: 4, kind: input, shape index: {}]   ;;  %s601_s5 = inlined_call_operand.hbm [shape: f32[8,128], index: 5, kind: output, shape index: {}]  }
   0x1   :  { %12 = vsyncpa [#allocation7], 0  ;;  %s30_s20 = sshll.u32 %s597_s1, 4  ;;  %s31_s20 = int_to_ptr.vmem [resolvable:$true] %s30_s20 }
   0x2   :  { %13 = vsyncpa [#allocation4], 0  ;;  %s20_s23 = sshll.u32 %s596_s0, 4  ;;  %s336_s24 = scalar_lea.vmem %s31_s20, 16  ;;  %s21_s23 = int_to_ptr.vmem [resolvable:$true] %s20_s23 }
   0x3   :  { %p337_p0 = scmp.ne.s32.totalorder %s31_s20, %s336_s24  ;;  %p341_p1 = scmp.lt.s32.totalorder %s31_s20, %s31_s20 }
   0x4   :  { %p342_p2 = scmp.lt.s32.totalorder %s336_s24, %s336_s24 }
   0x6   :  { %p343_p3 = por %p342_p2, %p341_p1 }
   0x8   :  { %p344_p4 = pnand %p343_p3, %p337_p0 }
   0xa   :  { %347 = shalt.err (!%p344_p4)
}
   0xb   :  { %s400_s25 = smov [#allocation6]   ;;  %s348_s26 = scalar_lea.vmem %s21_s23, 16 }
   0xc   :  { %33 = dma.vmem_to_smem %s31_s20, 16, %s400_s25, [#allocation7]  }
   0xd   :  { %p349_p5 = scmp.ne.s32.totalorder %s21_s23, %s348_s26  ;;  %p353_p6 = scmp.lt.s32.totalorder %s21_s23, %s21_s23 }
   0xe   :  { %p354_p7 = scmp.lt.s32.totalorder %s348_s26, %s348_s26 }
  0x10   :  { %p355_p8 = por %p354_p7, %p353_p6 }
  0x12   :  { %p356_p9 = pnand %p355_p8, %p349_p5 }
  0x14   :  { %359 = shalt.err (!%p356_p9)
}
  0x15   :  { %s401_s1 = smov [#allocation3]   ;;  %s40_s28 = sshll.u32 %s598_s2, 4  ;;  %s41_s28 = int_to_ptr.vmem [resolvable:$true] %s40_s28 }
  0x16   :  { %23 = dma.vmem_to_smem %s21_s23, 16, %s401_s1, [#allocation5]  }
  0x17   :  { %s360_s29 = scalar_lea.vmem %s41_s28, 16  ;;  %p365_p11 = scmp.lt.s32.totalorder %s41_s28, %s41_s28 }
  0x18   :  { %p361_p10 = scmp.ne.s32.totalorder %s41_s28, %s360_s29  ;;  %p366_p12 = scmp.lt.s32.totalorder %s360_s29, %s360_s29 }
  0x1a   :  { %p367_p13 = por %p366_p12, %p365_p11 }
  0x1c   :  { %p368_p0 = pnand %p367_p13, %p361_p10 }
  0x1e   :  { %371 = shalt.err (!%p368_p0)
}
  0x1f   :  { %s402_s30 = smov [#allocation8]  }
  0x20   :  { %43 = dma.vmem_to_smem %s41_s28, 16, %s402_s30, [#allocation7]  }
  0x21   :  { %394 = dma.done.wait [#allocation5], 16  }
  0x22   :  { %395 = vsyncadd [#allocation5], 4294967280 }
  0x23   :  { %396 = dma.done.wait [#allocation7], 32  }
  0x24   :  { %397 = vsyncadd [#allocation7], 4294967264 }
  0x25   :  { %57 = sfence }
  0x26   :  { %s59_s6 = sld [smem:[#allocation3]]  ;;  %s255_s8 = sld [smem:[#allocation3 + $0x1]]  ;;  %v448_v0 = vld [vmem:[%s600_s4] sm:$0xff] }
  0x27   :  { %s62_s7 = sld [smem:[#allocation6]]  ;;  %s256_s9 = sld [smem:[#allocation6 + $0x1]] }
  0x28   :  { %s258_s2 = sld [smem:[#allocation3 + $0x2]]  ;;  %s261_s13 = sld [smem:[#allocation3 + $0x3]] }
  0x29   :  { %s443_s10 = sld [smem:[#allocation6 + $0x2]]  ;;  %s450_s14 = sld [smem:[#allocation6 + $0x3]] }
  0x2a   :  { %s452_s15 = sld [smem:[#allocation3 + $0x4]]  ;;  %s457_s17 = sld [smem:[#allocation8]] }
  0x2b   :  { %s454_s16 = sld [smem:[#allocation6 + $0x4]]  ;;  %s459_s18 = sld [smem:[#allocation3 + $0x5]] }
  0x2c   :  { %v60_v1 = vstv %s59_s6  ;;  %v71_v4 = vstv %s255_s8  ;;  %s462_s4 = sld [smem:[#allocation8 + $0x1]]  ;;  %s464_s19 = sld [smem:[#allocation6 + $0x5]] }
  0x2d   :  { %v63_v2 = vstv %s62_s7  ;;  %v61_v3 = vmul.f32 %v60_v1, %v448_v0  ;;  %v72_v5 = vmul.f32 %v71_v4, %v448_v0  ;;  %v74_v6 = vstv %s256_s9  ;;  %s467_s20 = sld [smem:[#allocation3 + $0x6]]  ;;  %s472_s22 = sld [smem:[#allocation8 + $0x2]] }
  0x2e   :  { %v82_v8 = vstv %s258_s2  ;;  %s469_s21 = sld [smem:[#allocation6 + $0x6]]  ;;  %v93_v12 = vstv %s261_s13  ;;  %s474_s23 = sld [smem:[#allocation3 + $0x7]] }
  0x2f   :  { %v64_v7 = vadd.f32 %v63_v2, %v61_v3  ;;  %v85_v9 = vstv %s443_s10  ;;  %v75_v10 = vadd.f32 %v74_v6, %v72_v5  ;;  %v83_v11 = vmul.f32 %v82_v8, %v448_v0  ;;  %s478_s24 = sld [smem:[#allocation8 + $0x3]]  ;;  %s480_s25 = sld [smem:[#allocation6 + $0x7]] }
  0x30   :  { %v94_v13 = vmul.f32 %v93_v12, %v448_v0  ;;  %v96_v14 = vstv %s450_s14  ;;  %v104_v16 = vstv %s452_s15  ;;  %s484_s26 = sld [smem:[#allocation3 + $0x8]]  ;;  %s490_s0 = sld [smem:[#allocation3 + $0x9]]  ;;  %v67_v26 = vstv %s457_s17 }
  0x31   :  { %304 = vtanh.f32 %v64_v7  ;;  %v86_v15 = vadd.f32 %v85_v9, %v83_v11  ;;  %v107_v17 = vstv %s454_s16  ;;  %s486_s1 = sld [smem:[#allocation6 + $0x8]]  ;;  %v105_v19 = vmul.f32 %v104_v16, %v448_v0  ;;  %s492_s27 = sld [smem:[#allocation8 + $0x4]] }
  0x32   :  { %306 = vtanh.f32 %v75_v10  ;;  %v97_v18 = vadd.f32 %v96_v14, %v94_v13  ;;  %v115_v20 = vstv %s459_s18  ;;  %v118_v22 = vstv %s464_s19  ;;  %s496_s28 = sld [smem:[#allocation6 + $0x9]]  ;;  %s500_s29 = sld [smem:[#allocation3 + $0xa]] }
  0x33   :  { %308 = vtanh.f32 %v86_v15  ;;  %v116_v21 = vmul.f32 %v115_v20, %v448_v0  ;;  %v108_v23 = vadd.f32 %v107_v17, %v105_v19  ;;  %v126_v24 = vstv %s467_s20  ;;  %s502_s30 = sld [smem:[#allocation6 + $0xa]]  ;;  %s505_s6 = sld [smem:[#allocation8 + $0x5]] }
  0x34   :  { %310 = vtanh.f32 %v97_v18  ;;  %v129_v25 = vstv %s469_s21  ;;  %v127_v28 = vmul.f32 %v126_v24, %v448_v0  ;;  %v137_v29 = vstv %s474_s23  ;;  %s509_s7 = sld [smem:[#allocation3 + $0xb]]  ;;  %s518_s9 = sld [smem:[#allocation3 + $0xc]] }
  0x35   :  { %v119_v27 = vadd.f32 %v118_v22, %v116_v21  ;;  %v78_v30 = vstv %s462_s4  ;;  %312 = vtanh.f32 %v108_v23  ;;  %v138_v31 = vmul.f32 %v137_v29, %v448_v0  ;;  %s514_s8 = sld [smem:[#allocation6 + $0xb]]  ;;  %s520_s2 = sld [smem:[#allocation6 + $0xc]] }
  0x36   :  { %v140_v32 = vstv %s480_s25  ;;  %v130_v33 = vadd.f32 %v129_v25, %v127_v28  ;;  %v148_v34 = vstv %s484_s26  ;;  %v89_v36 = vstv %s472_s22  ;;  %s523_s10 = sld [smem:[#allocation8 + $0x6]]  ;;  %s527_s11 = sld [smem:[#allocation3 + $0xd]] }
  0x37   :  { %314 = vtanh.f32 %v119_v27  ;;  %v151_v35 = vstv %s486_s1  ;;  %v141_v37 = vadd.f32 %v140_v32, %v138_v31  ;;  %v149_v38 = vmul.f32 %v148_v34, %v448_v0  ;;  %s532_s12 = sld [smem:[#allocation6 + $0xd]]  ;;  %s534_s13 = sld [smem:[#allocation8 + $0x7]] }
  0x38   :  { %v159_v39 = vstv %s490_s0  ;;  %v100_v40 = vstv %s478_s24  ;;  %316 = vtanh.f32 %v130_v33  ;;  %v162_v42 = vstv %s496_s28  ;;  %s538_s14 = sld [smem:[#allocation3 + $0xe]]  ;;  %s546_s16 = sld [smem:[#allocation3 + $0xf]] }
  0x39   :  { %v160_v41 = vmul.f32 %v159_v39, %v448_v0  ;;  %318 = vtanh.f32 %v141_v37  ;;  %v152_v44 = vadd.f32 %v151_v35, %v149_v38  ;;  %v170_v45 = vstv %s500_s29  ;;  %s542_s15 = sld [smem:[#allocation6 + $0xe]]  ;;  %s549_s17 = sld [smem:[#allocation8 + $0x8]] }
  0x3a   :  { %v173_v46 = vstv %s502_s30  ;;  %v111_v49 = vstv %s492_s27  ;;  %v171_v51 = vmul.f32 %v170_v45, %v448_v0  ;;  %v181_v53 = vstv %s509_s7  ;;  %s554_s18 = sld [smem:[#allocation6 + $0xf]]  ;;  %s556_s4 = sld [smem:[#allocation8 + $0x9]] }
  0x3b   :  { %v305_v43 = vpop.eup %304  ;;  %v163_v50 = vadd.f32 %v162_v42, %v160_v41  ;;  %320 = vtanh.f32 %v152_v44  ;;  %v184_v54 = vstv %s514_s8  ;;  %v122_v56 = vstv %s505_s6  ;;  %s562_s19 = sld [smem:[#allocation8 + $0xa]]  ;;  %s567_s20 = sld [smem:[#allocation8 + $0xb]] }
  0x3c   :  { %v307_v47 = vpop.eup %306  ;;  %v68_v48 = vmul.f32 %v305_v43, %v67_v26  ;;  %v174_v57 = vadd.f32 %v173_v46, %v171_v51  ;;  %v182_v58 = vmul.f32 %v181_v53, %v448_v0  ;;  %v192_v62 = vstv %s518_s9  ;;  %s573_s21 = sld [smem:[#allocation8 + $0xc]]  ;;  %s293_s22 = sld [smem:[#allocation8 + $0xd]] }
  0x3d   :  { %v79_v52 = vmul.f32 %v307_v47, %v78_v30  ;;  %v309_v55 = vpop.eup %308  ;;  %322 = vtanh.f32 %v163_v50  ;;  %v195_v63 = vstv %s520_s2  ;;  %v193_v3 = vmul.f32 %v192_v62, %v448_v0  ;;  %s296_s23 = sld [smem:[#allocation8 + $0xe]]  ;;  %s299_s24 = sld [smem:[#allocation8 + $0xf]] }
  0x3e   :  { %v311_v59 = vpop.eup %310  ;;  %v90_v61 = vmul.f32 %v309_v55, %v89_v36  ;;  %324 = vtanh.f32 %v174_v57  ;;  %v185_v2 = vadd.f32 %v184_v54, %v182_v58  ;;  %v133_v6 = vstv %s523_s10  ;;  %s403_s1 = smov [#allocation9]  }
  0x3f   :  { %v80_v60 = vadd.f32 %v79_v52, %v68_v48  ;;  %v101_v1 = vmul.f32 %v311_v59, %v100_v40  ;;  %v313_v4 = vpop.eup %312  ;;  %v203_v7 = vstv %s527_s11  ;;  %v206_v8 = vstv %s532_s12  ;;  %s245_s0 = sshll.u32 %s403_s1, 4  ;;  %s246_s0 = int_to_ptr.vmem [resolvable:$true] %s245_s0 }
  0x40   :  { %v112_v10 = vmul.f32 %v313_v4, %v111_v49  ;;  %326 = vtanh.f32 %v185_v2  ;;  %v196_v11 = vadd.f32 %v195_v63, %v193_v3  ;;  %v204_v12 = vmul.f32 %v203_v7, %v448_v0  ;;  %s372_s27 = scalar_lea.vmem %s246_s0, 128  ;;  %p377_p2 = scmp.lt.s32.totalorder %s246_s0, %s246_s0 }
  0x41   :  { %v91_v5 = vadd.f32 %v90_v61, %v80_v60  ;;  %v315_v9 = vpop.eup %314  ;;  %v144_v15 = vstv %s534_s13  ;;  %v214_v16 = vstv %s538_s14  ;;  %v217_v20 = vstv %s542_s15  ;;  %p373_p1 = scmp.ne.s32.totalorder %s246_s0, %s372_s27  ;;  %p378_p3 = scmp.lt.s32.totalorder %s372_s27, %s372_s27 }
  0x42   :  { %v123_v14 = vmul.f32 %v315_v9, %v122_v56  ;;  %v317_v17 = vpop.eup %316  ;;  %328 = vtanh.f32 %v196_v11  ;;  %v207_v18 = vadd.f32 %v206_v8, %v204_v12  ;;  %v215_v19 = vmul.f32 %v214_v16, %v448_v0 }
  0x43   :  { %v102_v13 = vadd.f32 %v101_v1, %v91_v5  ;;  %v319_v21 = vpop.eup %318  ;;  %v134_v23 = vmul.f32 %v317_v17, %v133_v6  ;;  %v225_v24 = vstv %s546_s16  ;;  %v155_v25 = vstv %s549_s17  ;;  %p379_p4 = por %p378_p3, %p377_p2 }
  0x44   :  { %330 = vtanh.f32 %v207_v18  ;;  %v218_v26 = vadd.f32 %v217_v20, %v215_v19  ;;  %v226_v27 = vmul.f32 %v225_v24, %v448_v0  ;;  %v145_v30 = vmul.f32 %v319_v21, %v144_v15 }
  0x45   :  { %v113_v22 = vadd.f32 %v112_v10, %v102_v13  ;;  %v321_v28 = vpop.eup %320  ;;  %v228_v31 = vstv %s554_s18  ;;  %v166_v33 = vstv %s556_s4  ;;  %v177_v38 = vstv %s562_s19  ;;  %p380_p5 = pnand %p379_p4, %p373_p1 }
  0x46   :  { %332 = vtanh.f32 %v218_v26  ;;  %v229_v34 = vadd.f32 %v228_v31, %v226_v27  ;;  %v156_v36 = vmul.f32 %v321_v28, %v155_v25  ;;  %v188_v41 = vstv %s567_s20 }
  0x47   :  { %v124_v29 = vadd.f32 %v123_v14, %v113_v22  ;;  %v323_v32 = vpop.eup %322  ;;  %v199_v45 = vstv %s573_s21  ;;  %v210_v49 = vstv %s293_s22  ;;  %v221_v53 = vstv %s296_s23 }
  0x48   :  { %v325_v37 = vpop.eup %324  ;;  %334 = vtanh.f32 %v229_v34  ;;  %v167_v40 = vmul.f32 %v323_v32, %v166_v33  ;;  %v232_v57 = vstv %s299_s24  ;;  %v236_v63 = vstv %s599_s3 }
  0x49   :  { %v135_v35 = vadd.f32 %v134_v23, %v124_v29  ;;  %v178_v43 = vmul.f32 %v325_v37, %v177_v38 }
  0x4a   :  { %v327_v0 = vpop.eup %326 }
  0x4b   :  { %v146_v39 = vadd.f32 %v145_v30, %v135_v35  ;;  %v189_v47 = vmul.f32 %v327_v0, %v188_v41 }
  0x4c   :  { %v329_v44 = vpop.eup %328 }
  0x4d   :  { %v157_v42 = vadd.f32 %v156_v36, %v146_v39  ;;  %v200_v51 = vmul.f32 %v329_v44, %v199_v45 }
  0x4e   :  { %v331_v48 = vpop.eup %330 }
  0x4f   :  { %v168_v46 = vadd.f32 %v167_v40, %v157_v42  ;;  %v211_v55 = vmul.f32 %v331_v48, %v210_v49 }
  0x50   :  { %v333_v52 = vpop.eup %332 }
  0x51   :  { %v179_v50 = vadd.f32 %v178_v43, %v168_v46  ;;  %v222_v59 = vmul.f32 %v333_v52, %v221_v53 }
  0x52   :  { %v335_v56 = vpop.eup %334 }
  0x53   :  { %v190_v54 = vadd.f32 %v189_v47, %v179_v50  ;;  %v233_v61 = vmul.f32 %v335_v56, %v232_v57 }
  0x55   :  { %v201_v58 = vadd.f32 %v200_v51, %v190_v54 }
  0x57   :  { %v212_v60 = vadd.f32 %v211_v55, %v201_v58 }
  0x59   :  { %v223_v62 = vadd.f32 %v222_v59, %v212_v60 }
  0x5b   :  { %v234_v1 = vadd.f32 %v233_v61, %v223_v62 }
  0x5d   :  { %v237_v2 = vadd.f32 %v236_v63, %v234_v1 }
  0x5f   :  { %238 = vst [vmem:[#allocation9] sm:$0xff] %v237_v2 }
  0x60   :  { %383 = shalt.err (!%p380_p5)
}
  0x61   :  { %s384_s30 = scalar_lea.hbm %s601_s5, 128 }
  0x62   :  { %p385_p6 = scmp.ne.s32.totalorder %s601_s5, %s384_s30  ;;  %p388_p7 = scmp.lt.u32.totalorder %s384_s30, %s601_s5 }
  0x64   :  { %p390_p8 = pnand %p388_p7, %p385_p6 }
  0x66   :  { %393 = shalt.err (!%p390_p8)
}
  0x67   :  { %248 = dma.vmem_to_hbm [thread:$0]  %s246_s0, 128, %s601_s5, [#allocation4]  }
  0x68   :  { %398 = dma.done.wait [#allocation4], 128  }
  0x69   :  { %399 = vsyncadd [#allocation4], 4294967168 }
  0x6a   :  { %252 = vsyncpa [#allocation4], 1 }
  0x6b   :  { %253 = vsyncpa [#allocation5], 1 }
  0x6c   :  { %254 = vsyncpa [#allocation7], 1 }

</bundles_post_ra>
